<compile_context>
chip_gen: v6e
topology: v6e:2x2x1
jax: 0.10.0
libtpu: 0.0.40
codegen_flags: <defaults>
</compile_context>

<pallas_src>
import functools

import jax
import jax.numpy as jnp
from jax.experimental import pallas as pl
from jax.experimental.pallas import tpu as pltpu


# ---------------------------------------------------------------------------
# Kernels
# ---------------------------------------------------------------------------
def _fused_gcn_kernel(adj_ref, xc_ref, w1_ref, b1_ref, w2_ref, b2_ref, out_ref):
    """Both GCN layers with A, features and weights fully VMEM-resident."""
    adj = adj_ref[...]
    # Layer 1: h = relu((A @ xc) @ W1 + b1)   (propagate-then-transform)
    ax = jnp.dot(adj, xc_ref[...], preferred_element_type=jnp.float32)
    h = jnp.dot(ax.astype(w1_ref.dtype), w1_ref[...],
                preferred_element_type=jnp.float32) + b1_ref[...]
    h = jnp.maximum(h, 0.0).astype(adj.dtype)
    # Layer 2: y = (A @ h) @ W2 + b2
    ah = jnp.dot(adj, h, preferred_element_type=jnp.float32)
    y = jnp.dot(ah.astype(w2_ref.dtype), w2_ref[...],
                preferred_element_type=jnp.float32) + b2_ref[...]
    out_ref[...] = y.astype(out_ref.dtype)


def _gcn_layer_kernel(adj_ref, feat_ref, w_ref, b_ref, out_ref, acc_ref, *,
                      apply_relu, feat_resident, tk):
    """One GCN layer tile: acc += A_tile @ X_k ; finalize acc @ W + b (+relu)."""
    k = pl.program_id(1)

    @pl.when(k == 0)
    def _():
        acc_ref[...] = jnp.zeros_like(acc_ref)

    if feat_resident:
        # Whole feature matrix resident in VMEM; slice the K chunk in-kernel.
        start = pl.multiple_of(k * tk, tk)
        feat = feat_ref[pl.ds(start, tk), :]
    else:
        feat = feat_ref[...]

    # N^2-sized propagation: bf16 (or f32) inputs, f32 accumulation on MXU.
    acc_ref[...] += jnp.dot(adj_ref[...], feat,
                            preferred_element_type=jnp.float32)

    @pl.when(k == pl.num_programs(1) - 1)
    def _():
        # Small transform matmul (+ bias, + ReLU), once per output row tile.
        y = jnp.dot(acc_ref[...].astype(w_ref.dtype), w_ref[...],
                    preferred_element_type=jnp.float32) + b_ref[...]
        if apply_relu:
            y = jnp.maximum(y, 0.0)
        out_ref[...] = y.astype(out_ref.dtype)


# ---------------------------------------------------------------------------
# pallas_call wrappers
# ---------------------------------------------------------------------------
def _gcn_fused(adj_p, xc_p, w1_p, b1_p, w2_p, b2_p, *, out_dtype, vmem_limit):
    n_pad = adj_p.shape[0]
    c_pad = w2_p.shape[1]
    vmem_spec = pl.BlockSpec(memory_space=pltpu.MemorySpace.VMEM)
    return pl.pallas_call(
        _fused_gcn_kernel,
        out_shape=jax.ShapeDtypeStruct((n_pad, c_pad), out_dtype),
        in_specs=[vmem_spec] * 6,
        out_specs=vmem_spec,
        compiler_params=pltpu.CompilerParams(vmem_limit_bytes=vmem_limit),
    )(adj_p, xc_p, w1_p, b1_p, w2_p, b2_p)


def _gcn_layer(adj_p, feat_p, w_p, b_p, *, apply_relu, out_dtype, tm, tk,
               feat_resident, vmem_limit):
    n_pad = adj_p.shape[0]
    fw = feat_p.shape[1]          # (padded) input feature width
    ow = w_p.shape[1]             # (padded) output width
    grid = (n_pad // tm, n_pad // tk)

    if feat_resident:
        feat_spec = pl.BlockSpec((n_pad, fw), lambda i, k: (0, 0))   # resident
    else:
        feat_spec = pl.BlockSpec((tk, fw), lambda i, k: (k, 0))      # streamed

    kernel = functools.partial(_gcn_layer_kernel, apply_relu=apply_relu,
                               feat_resident=feat_resident, tk=tk)
    return pl.pallas_call(
        kernel,
        out_shape=jax.ShapeDtypeStruct((n_pad, ow), out_dtype),
        grid_spec=pltpu.PrefetchScalarGridSpec(
            num_scalar_prefetch=0,
            grid=grid,
            in_specs=[
                pl.BlockSpec((tm, tk), lambda i, k: (i, k)),   # adjacency tile
                feat_spec,                                     # source features
                pl.BlockSpec((fw, ow), lambda i, k: (0, 0)),   # weight (resident)
                pl.BlockSpec((1, ow), lambda i, k: (0, 0)),    # bias   (resident)
            ],
            out_specs=pl.BlockSpec((tm, ow), lambda i, k: (i, 0)),
            scratch_shapes=[pltpu.VMEM((tm, fw), jnp.float32)],
        ),
        compiler_params=pltpu.CompilerParams(
            dimension_semantics=("parallel", "arbitrary"),
            vmem_limit_bytes=vmem_limit,
        ),
    )(adj_p, feat_p, w_p, b_p)


# ---------------------------------------------------------------------------
# Host-side helpers
# ---------------------------------------------------------------------------
def _round_up(v, m):
    return ((v + m - 1) // m) * m


def _vmem_capacity_bytes():
    try:
        cap = getattr(pltpu.get_tpu_info(), "vmem_capacity_bytes", None)
        if cap:
            return int(cap)
    except Exception:
        pass
    return 64 * 1024 * 1024   # conservative (v7x per-core)


def _choose_tiling(n):
    """Pick the tile FIRST, then pad N up to a multiple of it.

    Prefers 1024/512/256 tiles when the extra adjacency padding stays under
    ~12.5%, so large graphs never fall back to 128x128 grid steps.  If the
    resulting row-tile count is odd, tm is halved so the "parallel" row axis
    splits evenly across v7x's two TensorCores.
    """
    base = _round_up(max(int(n), 1), 128)
    tk = 128
    for t in (1024, 512, 256):
        if _round_up(n, t) - base <= base // 8:
            tk = t
            break
    n_pad = _round_up(max(int(n), 1), tk)
    tm = tk
    rows = n_pad // tm
    if rows > 1 and rows % 2 == 1 and tm >= 256:
        tm //= 2
    return tm, tk, n_pad


def _pad2(a, rows, cols):
    return jnp.pad(a, ((0, rows - a.shape[0]), (0, cols - a.shape[1])))


def build_normalized_adjacency(edge_index, num_nodes, n_pad=None,
                               dtype=jnp.float32):
    """Dense D^{-1/2}(A + missing self loops)D^{-1/2}, matching PyG gcn_norm.

    Built directly at the padded size and cast once.  add_remaining_self_loops
    semantics: a self-loop of weight 1 is added only for (real) nodes that do
    not already have one; duplicate edges sum (scatter-add).  Padded rows and
    columns stay exactly zero (degree 0 -> dinv 0, no self loop added).
    """
    if n_pad is None:
        n_pad = num_nodes
    src = edge_index[0].astype(jnp.int32)
    dst = edge_index[1].astype(jnp.int32)
    adj = jnp.zeros((n_pad, n_pad), jnp.float32)
    adj = adj.at[dst, src].add(1.0)                       # message src -> dst
    node = jnp.arange(n_pad)
    has_self = jnp.diagonal(adj) > 0.0
    add_loop = jnp.where((node < num_nodes) & (~has_self), 1.0, 0.0)
    adj = adj + jnp.diag(add_loop)
    deg = adj.sum(axis=1)
    dinv = jnp.where(deg > 0.0, jax.lax.rsqrt(deg), 0.0)
    return (adj * dinv[:, None] * dinv[None, :]).astype(dtype)


def precompute_adjacency(edge_index, num_nodes, compute_dtype=jnp.bfloat16):
    """Padded, normalized, downcast adjacency — cache this across forwards."""
    _, _, n_pad = _choose_tiling(num_nodes)
    return build_normalized_adjacency(edge_index, num_nodes, n_pad=n_pad,
                                      dtype=compute_dtype)


def gcn_feature_anchored(x, edge_index, anchors, params, *,
                         compute_dtype=jnp.bfloat16,
                         adj_padded=None,
                         use_fused=None,
                         feature_vmem_budget=8 * 1024 * 1024):
    """Forward pass of GCN_Feature_Anchored.

    x: (N, F) float32, edge_index: (2, E) int32, anchors: (N, F) float32.
    adj_padded: optional cached output of precompute_adjacency(...).
    """
    n, f = x.shape
    w1, b1 = params["w1"], params["b1"]
    w2, b2 = params["w2"], params["b2"]
    hidden, out_ch = w1.shape[1], w2.shape[1]

    tm, tk, n_pad = _choose_tiling(n)
    f2_pad = _round_up(2 * f, 128)
    h_pad = _round_up(hidden, 128)
    c_pad = _round_up(out_ch, 128)

    itemsize = jnp.dtype(compute_dtype).itemsize
    cap = _vmem_capacity_bytes()
    vmem_limit = int(min(cap * 3 // 4, 100 * 1024 * 1024))

    if adj_padded is None:
        adj_padded = build_normalized_adjacency(edge_index, n, n_pad=n_pad,
                                                dtype=compute_dtype)
    else:
        assert adj_padded.shape == (n_pad, n_pad), \
            f"adj_padded must be {(n_pad, n_pad)}, got {adj_padded.shape}"
        adj_padded = adj_padded.astype(compute_dtype)

    # cat([x - anchors, anchors], dim=1) — lane-side, zero-padded & lane-dense.
    xc = jnp.concatenate([x - anchors, anchors], axis=1)
    xc_p = _pad2(xc, n_pad, f2_pad).astype(compute_dtype)

    # Weights in the compute dtype (bf16 transform, f32 accumulation); bias f32.
    w1_p = _pad2(w1, f2_pad, h_pad).astype(compute_dtype)
    b1_p = jnp.pad(b1.astype(jnp.float32), (0, h_pad - hidden)).reshape(1, h_pad)
    w2_p = _pad2(w2, h_pad, c_pad).astype(compute_dtype)
    b2_p = jnp.pad(b2.astype(jnp.float32), (0, c_pad - out_ch)).reshape(1, c_pad)

    if use_fused is None:
        fused_budget = min(cap * 2 // 5, 40 * 1024 * 1024)
        est = (n_pad * n_pad * itemsize                 # adjacency (resident)
               + n_pad * (f2_pad + h_pad) * itemsize    # xc + hidden activations
               + n_pad * max(f2_pad, h_pad) * 4         # f32 propagation buffer
               + n_pad * c_pad * 4)                     # f32 output
        use_fused = est <= fused_budget

    if use_fused:
        # A read from HBM once for both layers.
        out = _gcn_fused(adj_padded, xc_p, w1_p, b1_p, w2_p, b2_p,
                         out_dtype=jnp.float32, vmem_limit=vmem_limit)
    else:
        feat1_res = n_pad * f2_pad * itemsize <= feature_vmem_budget
        feat2_res = n_pad * h_pad * itemsize <= feature_vmem_budget
        # Layer 1: h = relu( (A @ [x-a | a]) @ W1 + b1 )
        h = _gcn_layer(adj_padded, xc_p, w1_p, b1_p, apply_relu=True,
                       out_dtype=compute_dtype, tm=tm, tk=tk,
                       feat_resident=feat1_res, vmem_limit=vmem_limit)
        # Layer 2: y = (A @ h) @ W2 + b2
        out = _gcn_layer(adj_padded, h, w2_p, b2_p, apply_relu=False,
                         out_dtype=jnp.float32, tm=tm, tk=tk,
                         feat_resident=feat2_res, vmem_limit=vmem_limit)
    return out[:n, :out_ch]


# ---------------------------------------------------------------------------
# Pure-JAX reference + test harness
# ---------------------------------------------------------------------------
def _reference(x, edge_index, anchors, params):
    n = x.shape[0]
    adj = build_normalized_adjacency(edge_index, n, n_pad=n, dtype=jnp.float32)
    xc = jnp.concatenate([x - anchors, anchors], axis=1)
    h = jnp.maximum(adj @ (xc @ params["w1"]) + params["b1"], 0.0)
    return adj @ (h @ params["w2"]) + params["b2"]


def _make_inputs(key, n, f, hidden, out_ch, extra_edges=0):
    kx, ka, kw1, kb1, kw2, kb2, ke = jax.random.split(key, 7)
    x = jax.random.normal(kx, (n, f), jnp.float32)
    anchors = jax.random.normal(ka, (n, f), jnp.float32)

    # Deterministic bidirectional ring plus optional random extra edges.
    idx = jnp.arange(n, dtype=jnp.int32)
    src = jnp.concatenate([idx, (idx + 1) % n])
    dst = jnp.concatenate([(idx + 1) % n, idx])
    if extra_edges:
        e = jax.random.randint(ke, (2, extra_edges), 0, n, jnp.int32)
        src = jnp.concatenate([src, e[0]])
        dst = jnp.concatenate([dst, e[1]])
    edge_index = jnp.stack([src, dst], axis=0)

    params = {
        "w1": jax.random.normal(kw1, (2 * f, hidden), jnp.float32)
              * (1.0 / jnp.sqrt(2.0 * f)),
        "b1": 0.1 * jax.random.normal(kb1, (hidden,), jnp.float32),
        "w2": jax.random.normal(kw2, (hidden, out_ch), jnp.float32)
              * (1.0 / jnp.sqrt(1.0 * hidden)),
        "b2": 0.1 * jax.random.normal(kb2, (out_ch,), jnp.float32),
    }
    return x, edge_index, anchors, params


if __name__ == "__main__":
    key = jax.random.PRNGKey(0)
    k1, k2 = jax.random.split(key)

    # Test 1: tiny graph (N=16, F=4, H=32, C=8) -> fused f32 path, tight tol.
    x, ei, anc, params = _make_inputs(k1, n=16, f=4, hidden=32, out_ch=8)
    out = jax.block_until_ready(
        gcn_feature_anchored(x, ei, anc, params, compute_dtype=jnp.float32))
    ref = _reference(x, ei, anc, params)
    assert out.shape == (16, 8)
    assert jnp.allclose(out, ref, atol=1e-4, rtol=1e-4), \
        f"fused f32 max err {float(jnp.max(jnp.abs(out - ref)))}"

    # Shared larger graph (N=300 + random extra edges).
    x, ei, anc, params = _make_inputs(k2, n=300, f=4, hidden=32, out_ch=8,
                                      extra_edges=256)
    ref = _reference(x, ei, anc, params)

    # Test 2: bf16 fused path (auto), adjacency precomputed once and reused.
    adj_bf16 = precompute_adjacency(ei, 300, compute_dtype=jnp.bfloat16)
    out = jax.block_until_ready(
        gcn_feature_anchored(x, ei, anc, params, compute_dtype=jnp.bfloat16,
                             adj_padded=adj_bf16))
    assert out.shape == (300, 8)
    assert jnp.allclose(out, ref, atol=1e-1, rtol=5e-2), \
        f"fused bf16 max err {float(jnp.max(jnp.abs(out - ref)))}"

    # Test 3: bf16 tiled path (forced), streaming (non-resident) features.
    out = jax.block_until_ready(
        gcn_feature_anchored(x, ei, anc, params, compute_dtype=jnp.bfloat16,
                             adj_padded=adj_bf16, use_fused=False,
                             feature_vmem_budget=0))
    assert jnp.allclose(out, ref, atol=1e-1, rtol=5e-2), \
        f"tiled bf16 max err {float(jnp.max(jnp.abs(out - ref)))}"

    # Test 4: f32 tiled path (forced), VMEM-resident features.
    out = jax.block_until_ready(
        gcn_feature_anchored(x, ei, anc, params, compute_dtype=jnp.float32,
                             use_fused=False))
    assert jnp.allclose(out, ref, atol=1e-3, rtol=1e-3), \
        f"tiled f32 max err {float(jnp.max(jnp.abs(out - ref)))}"

    print("KERNEL_OK")
</pallas_src>

<mosaic_0001>
module attributes {stable_mosaic.version = 11 : i64} {
  func.func @_fused_gcn_kernel(%arg0: memref<128x128xf32, #tpu.memory_space<vmem>>, %arg1: memref<128x128xf32, #tpu.memory_space<vmem>>, %arg2: memref<128x128xf32, #tpu.memory_space<vmem>>, %arg3: memref<1x128xf32, #tpu.memory_space<vmem>>, %arg4: memref<128x128xf32, #tpu.memory_space<vmem>>, %arg5: memref<1x128xf32, #tpu.memory_space<vmem>>, %arg6: memref<128x128xf32, #tpu.memory_space<vmem>>) attributes {dimension_semantics = [], scalar_prefetch = 0 : i64, scratch_operands = 0 : i64, tpu.core_type = #tpu.core_type<tc>} {
    %c0 = arith.constant 0 : index
    %c0_0 = arith.constant 0 : index
    %0 = vector.load %arg0[%c0, %c0_0] : memref<128x128xf32, #tpu.memory_space<vmem>>, vector<128x128xf32>
    %c0_1 = arith.constant 0 : index
    %c0_2 = arith.constant 0 : index
    %1 = vector.load %arg1[%c0_1, %c0_2] : memref<128x128xf32, #tpu.memory_space<vmem>>, vector<128x128xf32>
    %cst = arith.constant dense<0.000000e+00> : vector<128x128xf32>
    %2 = tpu.matmul %0, %1, %cst {dimension_numbers = #tpu.dot_dimension_numbers<[1], [0], [0], [1], [0, 0, 1, 1], [], []>} : vector<128x128xf32>, vector<128x128xf32>, vector<128x128xf32> -> vector<128x128xf32>
    %c0_3 = arith.constant 0 : index
    %c0_4 = arith.constant 0 : index
    %3 = vector.load %arg2[%c0_3, %c0_4] : memref<128x128xf32, #tpu.memory_space<vmem>>, vector<128x128xf32>
    %cst_5 = arith.constant dense<0.000000e+00> : vector<128x128xf32>
    %4 = tpu.matmul %2, %3, %cst_5 {dimension_numbers = #tpu.dot_dimension_numbers<[1], [0], [0], [1], [0, 0, 1, 1], [], []>} : vector<128x128xf32>, vector<128x128xf32>, vector<128x128xf32> -> vector<128x128xf32>
    %c0_6 = arith.constant 0 : index
    %c0_7 = arith.constant 0 : index
    %5 = vector.load %arg3[%c0_6, %c0_7] : memref<1x128xf32, #tpu.memory_space<vmem>>, vector<1x128xf32>
    %6 = vector.broadcast %5 : vector<1x128xf32> to vector<128x128xf32>
    %7 = arith.addf %4, %6 : vector<128x128xf32>
    %cst_8 = arith.constant 0.000000e+00 : f32
    %8 = vector.broadcast %cst_8 : f32 to vector<128x128xf32>
    %9 = arith.maximumf %7, %8 : vector<128x128xf32>
    %cst_9 = arith.constant dense<0.000000e+00> : vector<128x128xf32>
    %10 = tpu.matmul %0, %9, %cst_9 {dimension_numbers = #tpu.dot_dimension_numbers<[1], [0], [0], [1], [0, 0, 1, 1], [], []>} : vector<128x128xf32>, vector<128x128xf32>, vector<128x128xf32> -> vector<128x128xf32>
    %c0_10 = arith.constant 0 : index
    %c0_11 = arith.constant 0 : index
    %11 = vector.load %arg4[%c0_10, %c0_11] : memref<128x128xf32, #tpu.memory_space<vmem>>, vector<128x128xf32>
    %cst_12 = arith.constant dense<0.000000e+00> : vector<128x128xf32>
    %12 = tpu.matmul %10, %11, %cst_12 {dimension_numbers = #tpu.dot_dimension_numbers<[1], [0], [0], [1], [0, 0, 1, 1], [], []>} : vector<128x128xf32>, vector<128x128xf32>, vector<128x128xf32> -> vector<128x128xf32>
    %c0_13 = arith.constant 0 : index
    %c0_14 = arith.constant 0 : index
    %13 = vector.load %arg5[%c0_13, %c0_14] : memref<1x128xf32, #tpu.memory_space<vmem>>, vector<1x128xf32>
    %14 = vector.broadcast %13 : vector<1x128xf32> to vector<128x128xf32>
    %15 = arith.addf %12, %14 : vector<128x128xf32>
    %c0_15 = arith.constant 0 : index
    %c0_16 = arith.constant 0 : index
    %16 = vector.load %arg6[%c0_15, %c0_16] : memref<128x128xf32, #tpu.memory_space<vmem>>, vector<128x128xf32>
    tpu.vector_store %arg6[%c0_15, %c0_16], %15 {strides = array<i32>} : memref<128x128xf32, #tpu.memory_space<vmem>>, vector<128x128xf32>,
    return
  }
}

</mosaic_0001>

<bundles_post_ra>
// kernel: tpu_custom_call.1
= control target key start
LH: loop header
LB: loop body
LE: loop exit
PB: predicated region body
PF: predicated region fallthrough
CT: control target
= control target key end

     0   :  { %11 = vsyncpa [#allocation3], 0  ;;  %s1405_s0 = inlined_call_operand.hbm [shape: f32[128,128], index: 0, kind: input, shape index: {}]   ;;  %s1406_s1 = inlined_call_operand.hbm [shape: f32[128,128], index: 1, kind: input, shape index: {}]   ;;  %s1407_s2 = inlined_call_operand.hbm [shape: f32[128,128], index: 2, kind: input, shape index: {}]   ;;  %s1408_s3 = inlined_call_operand.vmem [shape: f32[1,128], index: 3, kind: input, shape index: {}]   ;;  %s1409_s4 = inlined_call_operand.hbm [shape: f32[128,128], index: 4, kind: input, shape index: {}]   ;;  %s1410_s5 = inlined_call_operand.vmem [shape: f32[1,128], index: 5, kind: input, shape index: {}]   ;;  %s1411_s6 = inlined_call_operand.hbm [shape: f32[128,128], index: 6, kind: output, shape index: {}]  }
   0x1   :  { %12 = vsyncpa [#allocation6], 0 }
   0x2   :  { %13 = vsyncpa [#allocation9], 0 }
   0x3   :  { %14 = vsyncpa [#allocation4], 0  ;;  %s1257_s21 = smov [#allocation5]   ;;  %s1258_s23 = smov [#allocation2]  }
   0x4   :  { %s32_s22 = sshll.u32 %s1257_s21, 4  ;;  %s20_s24 = sshll.u32 %s1258_s23, 4  ;;  %s33_s22 = int_to_ptr.vmem [resolvable:$true] %s32_s22  ;;  %s21_s24 = int_to_ptr.vmem [resolvable:$true] %s20_s24 }
   0x5   :  { %s1157_s25 = scalar_lea.vmem %s33_s22, 2048  ;;  %p1162_p1 = scmp.lt.s32.totalorder %s33_s22, %s33_s22 }
   0x6   :  { %p1158_p0 = scmp.ne.s32.totalorder %s33_s22, %s1157_s25  ;;  %p1163_p2 = scmp.lt.s32.totalorder %s1157_s25, %s1157_s25 }
   0x8   :  { %p1164_p3 = por %p1163_p2, %p1162_p1 }
   0xa   :  { %p1165_p4 = pnand %p1164_p3, %p1158_p0 }
   0xc   :  { %1168 = shalt.err (!%p1165_p4)
}
   0xd   :  { %s1259_s26 = smov 128   ;;  %s1260_s27 = smov 8  }
   0xe   :  { %38 = dma.hbm_to_vmem [thread:$0]  %s1406_s1, 2048, %s33_s22, [#allocation6], %s1259_s26, %s1259_s26, %s1260_s27  }
   0xf   :  { %s1177_s30 = scalar_lea.vmem %s21_s24, 2048  ;;  %p1182_p6 = scmp.lt.s32.totalorder %s21_s24, %s21_s24 }
  0x10   :  { %p1178_p5 = scmp.ne.s32.totalorder %s21_s24, %s1177_s30  ;;  %p1183_p7 = scmp.lt.s32.totalorder %s1177_s30, %s1177_s30 }
  0x12   :  { %p1184_p8 = por %p1183_p7, %p1182_p6 }
  0x14   :  { %p1185_p9 = pnand %p1184_p8, %p1178_p5 }
  0x16   :  { %1188 = shalt.err (!%p1185_p9)
}
  0x17   :  { %26 = dma.hbm_to_vmem [thread:$0]  %s1405_s0, 2048, %s21_s24, [#allocation3], %s1259_s26, %s1259_s26, %s1260_s27  }
  0x18   :  { %s1261_s9 = smov [#allocation7]   ;;  %s1262_s11 = smov [#allocation8]  }
  0x19   :  { %s44_s10 = sshll.u32 %s1261_s9, 4  ;;  %s58_s12 = sshll.u32 %s1262_s11, 4  ;;  %s45_s10 = int_to_ptr.vmem [resolvable:$true] %s44_s10  ;;  %s59_s12 = int_to_ptr.vmem [resolvable:$true] %s58_s12 }
  0x1a   :  { %s1197_s1 = scalar_lea.vmem %s45_s10, 2048  ;;  %p1202_p11 = scmp.lt.s32.totalorder %s45_s10, %s45_s10 }
  0x1b   :  { %p1198_p10 = scmp.ne.s32.totalorder %s45_s10, %s1197_s1  ;;  %p1203_p12 = scmp.lt.s32.totalorder %s1197_s1, %s1197_s1 }
  0x1d   :  { %p1204_p13 = por %p1203_p12, %p1202_p11 }
  0x1f   :  { %p1205_p0 = pnand %p1204_p13, %p1198_p10 }
  0x21   :  { %1208 = shalt.err (!%p1205_p0)
}
  0x22   :  { %50 = dma.hbm_to_vmem [thread:$0]  %s1407_s2, 2048, %s45_s10, [#allocation6], %s1259_s26, %s1259_s26, %s1260_s27  }
  0x23   :  { %s1217_s0 = scalar_lea.vmem %s59_s12, 2048  ;;  %p1222_p2 = scmp.lt.s32.totalorder %s59_s12, %s59_s12 }
  0x24   :  { %p1218_p1 = scmp.ne.s32.totalorder %s59_s12, %s1217_s0  ;;  %p1223_p3 = scmp.lt.s32.totalorder %s1217_s0, %s1217_s0 }
  0x26   :  { %p1224_p4 = por %p1223_p3, %p1222_p2 }
  0x28   :  { %p1225_p5 = pnand %p1224_p4, %p1218_p1 }
  0x2a   :  { %1228 = shalt.err (!%p1225_p5)
}
  0x2b   :  { %64 = dma.hbm_to_vmem [thread:$0]  %s1409_s4, 2048, %s59_s12, [#allocation9], %s1259_s26, %s1259_s26, %s1260_s27  }
  0x2c   :  { %1249 = dma.done.wait [#allocation3], 2048  }
  0x2d   :  { %1250 = vsyncadd [#allocation3], 4294965248 }
  0x2e   :  { %1251 = dma.done.wait [#allocation6], 4096  }
  0x2f   :  { %1252 = vsyncadd [#allocation6], 4294963200 }
  0x30   :  { %1253 = dma.done.wait [#allocation9], 2048  }
  0x31   :  { %1254 = vsyncadd [#allocation9], 4294965248  ;;  %v110_v0 = vld [vmem:[#allocation5 + $0x78] sm:$0xff]  ;;  %v109_v1 = vld [vmem:[#allocation5 + $0x70] sm:$0xff] }
  0x32   :  { %918 = vmatprep.subr.mxu0 %v110_v0  ;;  %v108_v2 = vld [vmem:[#allocation5 + $0x68] sm:$0xff]  ;;  %v107_v3 = vld [vmem:[#allocation5 + $0x60] sm:$0xff]  ;;  %v106_v5 = vld [vmem:[#allocation5 + $0x58] sm:$0xff] }
  0x33   :  { %919 = vmatpush3.msra.mxu0 %v110_v0  ;;  %v1323_v4 = vld [vmem:[#allocation2] sm:$0xff]  ;;  %v105_v6 = vld [vmem:[#allocation5 + $0x50] sm:$0xff]  ;;  %v104_v7 = vld [vmem:[#allocation5 + $0x48] sm:$0xff] }
  0x34   :  { %920 = vmatprep.subr.mxu0 %v109_v1  ;;  %950 = vmatprep.mubr.f32.mxu0 %v1323_v4  ;;  %v271_v8 = vld [vmem:[#allocation7 + $0x78] sm:$0xff]  ;;  %v270_v9 = vld [vmem:[#allocation7 + $0x70] sm:$0xff]  ;;  %v103_v10 = vld [vmem:[#allocation5 + $0x40] sm:$0xff] }
  0x35   :  { %921 = vmatpush3.msra.mxu0 %v109_v1  ;;  %974 = vmatprep.subr.mxu1 %v271_v8  ;;  %v269_v11 = vld [vmem:[#allocation7 + $0x68] sm:$0xff]  ;;  %v102_v12 = vld [vmem:[#allocation5 + $0x38] sm:$0xff]  ;;  %v268_v13 = vld [vmem:[#allocation7 + $0x60] sm:$0xff] }
  0x36   :  { %922 = vmatprep.subr.mxu0 %v108_v2  ;;  %975 = vmatpush3.msra.mxu1 %v271_v8  ;;  %v101_v14 = vld [vmem:[#allocation5 + $0x30] sm:$0xff]  ;;  %v267_v15 = vld [vmem:[#allocation7 + $0x58] sm:$0xff]  ;;  %v100_v16 = vld [vmem:[#allocation5 + $0x28] sm:$0xff] }
  0x37   :  { %923 = vmatpush3.msra.mxu0 %v108_v2  ;;  %976 = vmatprep.subr.mxu1 %v270_v9  ;;  %v266_v17 = vld [vmem:[#allocation7 + $0x50] sm:$0xff]  ;;  %v99_v18 = vld [vmem:[#allocation5 + $0x20] sm:$0xff]  ;;  %v265_v19 = vld [vmem:[#allocation7 + $0x48] sm:$0xff] }
  0x38   :  { %924 = vmatprep.subr.mxu0 %v107_v3  ;;  %977 = vmatpush3.msra.mxu1 %v270_v9  ;;  %v98_v20 = vld [vmem:[#allocation5 + $0x18] sm:$0xff]  ;;  %v264_v21 = vld [vmem:[#allocation7 + $0x40] sm:$0xff]  ;;  %v97_v22 = vld [vmem:[#allocation5 + $0x10] sm:$0xff] }
  0x39   :  { %925 = vmatpush3.msra.mxu0 %v107_v3  ;;  %978 = vmatprep.subr.mxu1 %v269_v11  ;;  %v263_v23 = vld [vmem:[#allocation7 + $0x38] sm:$0xff]  ;;  %v96_v24 = vld [vmem:[#allocation5 + $0x8] sm:$0xff]  ;;  %v262_v25 = vld [vmem:[#allocation7 + $0x30] sm:$0xff] }
  0x3a   :  { %926 = vmatprep.subr.mxu0 %v106_v5  ;;  %979 = vmatpush3.msra.mxu1 %v269_v11  ;;  %v95_v26 = vld [vmem:[#allocation5] sm:$0xff]  ;;  %v261_v27 = vld [vmem:[#allocation7 + $0x28] sm:$0xff]  ;;  %v1328_v30 = vld [vmem:[#allocation2 + $0x10] sm:$0xff] }
  0x3b   :  { %927 = vmatpush3.msra.mxu0 %v106_v5  ;;  %980 = vmatprep.subr.mxu1 %v268_v13  ;;  %v1326_v28 = vld [vmem:[#allocation2 + $0x8] sm:$0xff]  ;;  %v260_v29 = vld [vmem:[#allocation7 + $0x20] sm:$0xff]  ;;  %v259_v31 = vld [vmem:[#allocation7 + $0x18] sm:$0xff] }
  0x3c   :  { %928 = vmatprep.subr.mxu0 %v105_v6  ;;  %981 = vmatpush3.msra.mxu1 %v268_v13  ;;  %v1332_v32 = vld [vmem:[#allocation2 + $0x18] sm:$0xff]  ;;  %v258_v33 = vld [vmem:[#allocation7 + $0x10] sm:$0xff]  ;;  %v1334_v34 = vld [vmem:[#allocation2 + $0x20] sm:$0xff] }
  0x3d   :  { %929 = vmatpush3.msra.mxu0 %v105_v6  ;;  %982 = vmatprep.subr.mxu1 %v267_v15  ;;  %v1338_v35 = vld [vmem:[#allocation2 + $0x28] sm:$0xff]  ;;  %v1340_v36 = vld [vmem:[#allocation2 + $0x30] sm:$0xff]  ;;  %v1344_v37 = vld [vmem:[#allocation2 + $0x38] sm:$0xff] }
  0x3e   :  { %930 = vmatprep.subr.mxu0 %v104_v7  ;;  %983 = vmatpush3.msra.mxu1 %v267_v15  ;;  %v1346_v38 = vld [vmem:[#allocation2 + $0x40] sm:$0xff]  ;;  %v1350_v39 = vld [vmem:[#allocation2 + $0x48] sm:$0xff]  ;;  %v1352_v40 = vld [vmem:[#allocation2 + $0x50] sm:$0xff] }
  0x3f   :  { %931 = vmatpush3.msra.mxu0 %v104_v7  ;;  %984 = vmatprep.subr.mxu1 %v266_v17  ;;  %v1356_v41 = vld [vmem:[#allocation2 + $0x58] sm:$0xff]  ;;  %v1358_v42 = vld [vmem:[#allocation2 + $0x60] sm:$0xff]  ;;  %v1362_v43 = vld [vmem:[#allocation2 + $0x68] sm:$0xff] }
  0x40   :  { %932 = vmatprep.subr.mxu0 %v103_v10  ;;  %985 = vmatpush3.msra.mxu1 %v266_v17  ;;  %v1364_v44 = vld [vmem:[#allocation2 + $0x70] sm:$0xff]  ;;  %v1368_v45 = vld [vmem:[#allocation2 + $0x78] sm:$0xff]  ;;  %v257_v46 = vld [vmem:[#allocation7 + $0x8] sm:$0xff] }
  0x41   :  { %933 = vmatpush3.msra.mxu0 %v103_v10  ;;  %986 = vmatprep.subr.mxu1 %v265_v19  ;;  %v256_v47 = vld [vmem:[#allocation7] sm:$0xff]  ;;  %v600_v0 = vld [vmem:[#allocation8 + $0x78] sm:$0xff]  ;;  %v599_v1 = vld [vmem:[#allocation8 + $0x70] sm:$0xff] }
  0x42   :  { %934 = vmatprep.subr.mxu0 %v102_v12  ;;  %987 = vmatpush3.msra.mxu1 %v265_v19  ;;  %v598_v2 = vld [vmem:[#allocation8 + $0x68] sm:$0xff]  ;;  %v597_v3 = vld [vmem:[#allocation8 + $0x60] sm:$0xff]  ;;  %v595_v5 = vld [vmem:[#allocation8 + $0x50] sm:$0xff] }
  0x43   :  { %935 = vmatpush3.msra.mxu0 %v102_v12  ;;  %988 = vmatprep.subr.mxu1 %v264_v21  ;;  %v594_v6 = vld [vmem:[#allocation8 + $0x48] sm:$0xff]  ;;  %v593_v7 = vld [vmem:[#allocation8 + $0x40] sm:$0xff]  ;;  %v592_v8 = vld [vmem:[#allocation8 + $0x38] sm:$0xff] }
  0x44   :  { %936 = vmatprep.subr.mxu0 %v101_v14  ;;  %989 = vmatpush3.msra.mxu1 %v264_v21  ;;  %v591_v9 = vld [vmem:[#allocation8 + $0x30] sm:$0xff]  ;;  %v590_v10 = vld [vmem:[#allocation8 + $0x28] sm:$0xff]  ;;  %v589_v11 = vld [vmem:[#allocation8 + $0x20] sm:$0xff] }
  0x45   :  { %937 = vmatpush3.msra.mxu0 %v101_v14  ;;  %990 = vmatprep.subr.mxu1 %v263_v23  ;;  %v588_v12 = vld [vmem:[#allocation8 + $0x18] sm:$0xff]  ;;  %v587_v13 = vld [vmem:[#allocation8 + $0x10] sm:$0xff] }
  0x46   :  { %938 = vmatprep.subr.mxu0 %v100_v16  ;;  %991 = vmatpush3.msra.mxu1 %v263_v23 }
  0x47   :  { %939 = vmatpush3.msra.mxu0 %v100_v16  ;;  %992 = vmatprep.subr.mxu1 %v262_v25 }
  0x48   :  { %940 = vmatprep.subr.mxu0 %v99_v18  ;;  %993 = vmatpush3.msra.mxu1 %v262_v25 }
  0x49   :  { %941 = vmatpush3.msra.mxu0 %v99_v18  ;;  %994 = vmatprep.subr.mxu1 %v261_v27 }
  0x4a   :  { %942 = vmatprep.subr.mxu0 %v98_v20  ;;  %995 = vmatpush3.msra.mxu1 %v261_v27 }
  0x4b   :  { %943 = vmatpush3.msra.mxu0 %v98_v20  ;;  %996 = vmatprep.subr.mxu1 %v260_v29 }
  0x4c   :  { %944 = vmatprep.subr.mxu0 %v97_v22  ;;  %997 = vmatpush3.msra.mxu1 %v260_v29  ;;  %v788_v29 = vld [vmem:[%s1408_s3] ss:$0 sm:$0xff] }
  0x4d   :  { %945 = vmatpush3.msra.mxu0 %v97_v22  ;;  %998 = vmatprep.subr.mxu1 %v259_v31 }
  0x4e   :  { %946 = vmatprep.subr.mxu0 %v96_v24  ;;  %999 = vmatpush3.msra.mxu1 %v259_v31 }
  0x4f   :  { %947 = vmatpush3.msra.mxu0 %v96_v24  ;;  %1000 = vmatprep.subr.mxu1 %v258_v33 }
  0x50   :  { %948 = vmatprep.subr.mxu0 %v95_v26  ;;  %1001 = vmatpush3.msra.mxu1 %v258_v33 }
  0x51   :  { %949 = vmatpush3.msra.mxu0 %v95_v26  ;;  %1002 = vmatprep.subr.mxu1 %v257_v46 }
  0x52   :  { %951 = vmatmul.mubr.f32.vlgmr.msra.gmra.mxu0 %v1326_v28  ;;  %1003 = vmatpush3.msra.mxu1 %v257_v46 }
  0x53   :  { %953 = vmatprep.mubr.f32.mxu0 %v1328_v30  ;;  %1004 = vmatprep.subr.mxu1 %v256_v47 }
  0x54   :  { %1005 = vmatpush3.msra.mxu1 %v256_v47 }
  0x55   :  { %1086 = vmatprep.subr.mxu1 %v600_v0 }
  0x56   :  { %954 = vmatmul.mubr.f32.gmra.mxu0 %v1332_v32 }
  0x57   :  { %956 = vmatprep.mubr.f32.mxu0 %v1334_v34 }
  0x5a   :  { %957 = vmatmul.mubr.f32.gmra.mxu0 %v1338_v35 }
  0x5b   :  { %959 = vmatprep.mubr.f32.mxu0 %v1340_v36 }
  0x5e   :  { %960 = vmatmul.mubr.f32.gmra.mxu0 %v1344_v37 }
  0x5f   :  { %962 = vmatprep.mubr.f32.mxu0 %v1346_v38 }
  0x62   :  { %963 = vmatmul.mubr.f32.gmra.mxu0 %v1350_v39 }
  0x63   :  { %965 = vmatprep.mubr.f32.mxu0 %v1352_v40 }
  0x66   :  { %966 = vmatmul.mubr.f32.gmra.mxu0 %v1356_v41 }
  0x67   :  { %968 = vmatprep.mubr.f32.mxu0 %v1358_v42 }
  0x6a   :  { %969 = vmatmul.mubr.f32.gmra.mxu0 %v1362_v43 }
  0x6b   :  { %971 = vmatprep.mubr.f32.mxu0 %v1364_v44 }
  0x6e   :  { %972 = vmatmul.mubr.f32.gmra.mxu0 %v1368_v45 }
  0x6f   :  { %1062 = vmatprep.mubr.f32.mxu0 %v1323_v4  ;;  %v596_v4 = vld [vmem:[#allocation8 + $0x58] sm:$0xff] }
 0x112   :  { %v952_v48 = vpop.f32.mrf.mxu0 }
 0x114   :  { %v177_v49 = vpop.f32.mrf.mxu0 }
 0x115   :  { %1006 = vmatprep.mubr.f32.mxu1 %v177_v49 }
 0x116   :  { %v955_v50 = vpop.f32.mrf.mxu0  ;;  %1007 = vmatmul.mubr.f32.vlgmr.msra.gmra.mxu1 %v952_v48 }
 0x117   :  { %1087 = vmatpush3.msra.mxu1 %v600_v0 }
 0x118   :  { %v187_v51 = vpop.f32.mrf.mxu0  ;;  %1088 = vmatprep.subr.mxu1 %v599_v1 }
 0x119   :  { %1009 = vmatprep.mubr.f32.mxu1 %v187_v51  ;;  %1089 = vmatpush3.msra.mxu1 %v599_v1 }
 0x11a   :  { %v958_v52 = vpop.f32.mrf.mxu0  ;;  %1010 = vmatmul.mubr.f32.gmra.mxu1 %v955_v50  ;;  %1090 = vmatprep.subr.mxu1 %v598_v2 }
 0x11b   :  { %1091 = vmatpush3.msra.mxu1 %v598_v2 }
 0x11c   :  { %v197_v53 = vpop.f32.mrf.mxu0  ;;  %1092 = vmatprep.subr.mxu1 %v597_v3 }
 0x11d   :  { %1012 = vmatprep.mubr.f32.mxu1 %v197_v53  ;;  %1093 = vmatpush3.msra.mxu1 %v597_v3 }
 0x11e   :  { %v961_v54 = vpop.f32.mrf.mxu0  ;;  %1013 = vmatmul.mubr.f32.gmra.mxu1 %v958_v52  ;;  %1094 = vmatprep.subr.mxu1 %v596_v4 }
 0x11f   :  { %1095 = vmatpush3.msra.mxu1 %v596_v4 }
 0x120   :  { %v207_v55 = vpop.f32.mrf.mxu0  ;;  %1096 = vmatprep.subr.mxu1 %v595_v5 }
 0x121   :  { %1015 = vmatprep.mubr.f32.mxu1 %v207_v55  ;;  %1097 = vmatpush3.msra.mxu1 %v595_v5 }
 0x122   :  { %v964_v56 = vpop.f32.mrf.mxu0  ;;  %1016 = vmatmul.mubr.f32.gmra.mxu1 %v961_v54  ;;  %1098 = vmatprep.subr.mxu1 %v594_v6 }
 0x123   :  { %1099 = vmatpush3.msra.mxu1 %v594_v6 }
 0x124   :  { %v217_v57 = vpop.f32.mrf.mxu0  ;;  %1100 = vmatprep.subr.mxu1 %v593_v7 }
 0x125   :  { %1018 = vmatprep.mubr.f32.mxu1 %v217_v57  ;;  %1101 = vmatpush3.msra.mxu1 %v593_v7 }
 0x126   :  { %v967_v58 = vpop.f32.mrf.mxu0  ;;  %1019 = vmatmul.mubr.f32.gmra.mxu1 %v964_v56  ;;  %1102 = vmatprep.subr.mxu1 %v592_v8 }
 0x127   :  { %1103 = vmatpush3.msra.mxu1 %v592_v8 }
 0x128   :  { %v227_v59 = vpop.f32.mrf.mxu0  ;;  %1104 = vmatprep.subr.mxu1 %v591_v9 }
 0x129   :  { %1021 = vmatprep.mubr.f32.mxu1 %v227_v59  ;;  %1105 = vmatpush3.msra.mxu1 %v591_v9 }
 0x12a   :  { %v970_v60 = vpop.f32.mrf.mxu0  ;;  %1022 = vmatmul.mubr.f32.gmra.mxu1 %v967_v58  ;;  %1106 = vmatprep.subr.mxu1 %v590_v10 }
 0x12b   :  { %1107 = vmatpush3.msra.mxu1 %v590_v10 }
 0x12c   :  { %v237_v61 = vpop.f32.mrf.mxu0  ;;  %1108 = vmatprep.subr.mxu1 %v589_v11 }
 0x12d   :  { %1024 = vmatprep.mubr.f32.mxu1 %v237_v61  ;;  %1109 = vmatpush3.msra.mxu1 %v589_v11 }
 0x12e   :  { %v973_v62 = vpop.f32.mrf.mxu0  ;;  %1025 = vmatmul.mubr.f32.gmra.mxu1 %v970_v60  ;;  %1110 = vmatprep.subr.mxu1 %v588_v12 }
 0x12f   :  { %1111 = vmatpush3.msra.mxu1 %v588_v12 }
 0x130   :  { %v247_v63 = vpop.f32.mrf.mxu0  ;;  %1112 = vmatprep.subr.mxu1 %v587_v13 }
 0x131   :  { %1027 = vmatprep.mubr.f32.mxu1 %v247_v63  ;;  %1113 = vmatpush3.msra.mxu1 %v587_v13 }
 0x132   :  { %1028 = vmatmul.mubr.f32.gmra.mxu1 %v973_v62 }
 0x1d6   :  { %v1372_v14 = vpop.f32.mrf.mxu1 }
 0x1d7   :  { %v351_v8 = vadd.f32 %v1372_v14, %v788_v29 }
 0x1d8   :  { %v1374_v15 = vpop.f32.mrf.mxu1 }
 0x1d9   :  { %v346_v10 = vadd.f32 %v788_v29, %v1374_v15  ;;  %v425_v12 = vmax.f32 %v351_v8, 0.0 }
 0x1da   :  { %v1011_v16 = vpop.f32.mrf.mxu1 }
 0x1db   :  { %v361_v4 = vadd.f32 %v1011_v16, %v788_v29  ;;  %v424_v13 = vmax.f32 %v346_v10, 0.0 }
 0x1dc   :  { %v355_v17 = vpop.f32.mrf.mxu1 }
 0x1dd   :  { %v356_v6 = vadd.f32 %v788_v29, %v355_v17  ;;  %v427_v9 = vmax.f32 %v361_v4, 0.0  ;;  %v789_v17 = vld [vmem:[%s1410_s5] ss:$0 sm:$0xff]  ;;  %s1263_s5 = smov [#allocation10]  }
 0x1de   :  { %v1014_v18 = vpop.f32.mrf.mxu1  ;;  %s774_s18 = sshll.u32 %s1263_s5, 4  ;;  %s775_s18 = int_to_ptr.vmem [resolvable:$true] %s774_s18 }
 0x1df   :  { %v371_v0 = vadd.f32 %v1014_v18, %v788_v29  ;;  %v426_v11 = vmax.f32 %v356_v6, 0.0  ;;  %s1229_s19 = scalar_lea.vmem %s775_s18, 2048  ;;  %p1234_p7 = scmp.lt.s32.totalorder %s775_s18, %s775_s18 }
 0x1e0   :  { %v365_v19 = vpop.f32.mrf.mxu1  ;;  %p1230_p6 = scmp.ne.s32.totalorder %s775_s18, %s1229_s19  ;;  %p1235_p8 = scmp.lt.s32.totalorder %s1229_s19, %s1229_s19 }
 0x1e1   :  { %v366_v2 = vadd.f32 %v788_v29, %v365_v19  ;;  %v429_v5 = vmax.f32 %v371_v0, 0.0 }
 0x1e2   :  { %v1017_v20 = vpop.f32.mrf.mxu1  ;;  %p1236_p9 = por %p1235_p8, %p1234_p7 }
 0x1e3   :  { %v381_v60 = vadd.f32 %v1017_v20, %v788_v29  ;;  %v428_v7 = vmax.f32 %v366_v2, 0.0 }
 0x1e4   :  { %v375_v21 = vpop.f32.mrf.mxu1  ;;  %p1237_p10 = pnand %p1236_p9, %p1230_p6 }
 0x1e5   :  { %v376_v62 = vadd.f32 %v788_v29, %v375_v21  ;;  %v431_v1 = vmax.f32 %v381_v60, 0.0 }
 0x1e6   :  { %v1020_v22 = vpop.f32.mrf.mxu1 }
 0x1e7   :  { %v391_v56 = vadd.f32 %v1020_v22, %v788_v29  ;;  %v430_v3 = vmax.f32 %v376_v62, 0.0 }
 0x1e8   :  { %v385_v23 = vpop.f32.mrf.mxu1 }
 0x1e9   :  { %v386_v58 = vadd.f32 %v788_v29, %v385_v23  ;;  %v433_v61 = vmax.f32 %v391_v56, 0.0 }
 0x1ea   :  { %v1023_v24 = vpop.f32.mrf.mxu1 }
 0x1eb   :  { %v401_v52 = vadd.f32 %v1023_v24, %v788_v29  ;;  %v432_v63 = vmax.f32 %v386_v58, 0.0 }
 0x1ec   :  { %v395_v25 = vpop.f32.mrf.mxu1 }
 0x1ed   :  { %v396_v54 = vadd.f32 %v788_v29, %v395_v25  ;;  %v435_v57 = vmax.f32 %v401_v52, 0.0 }
 0x1ee   :  { %v1026_v26 = vpop.f32.mrf.mxu1 }
 0x1ef   :  { %v411_v47 = vadd.f32 %v1026_v26, %v788_v29  ;;  %v434_v59 = vmax.f32 %v396_v54, 0.0 }
 0x1f0   :  { %v405_v27 = vpop.f32.mrf.mxu1 }
 0x1f1   :  { %v406_v50 = vadd.f32 %v788_v29, %v405_v27  ;;  %v437_v53 = vmax.f32 %v411_v47, 0.0 }
 0x1f2   :  { %v1029_v31 = vpop.f32.mrf.mxu1 }
 0x1f3   :  { %v421_v33 = vadd.f32 %v1029_v31, %v788_v29  ;;  %v436_v55 = vmax.f32 %v406_v50, 0.0 }
 0x1f4   :  { %v415_v46 = vpop.f32.mrf.mxu1 }
 0x1f5   :  { %v439_v48 = vmax.f32 %v421_v33, 0.0  ;;  %v416_v49 = vadd.f32 %v788_v29, %v415_v46 }
 0x1f7   :  { %v438_v51 = vmax.f32 %v416_v49, 0.0  ;;  %1030 = vmatprep.subr.mxu0 %v439_v48 }
 0x1f8   :  { %1031 = vmatpush3.msra.mxu0 %v439_v48 }
 0x1f9   :  { %1032 = vmatprep.subr.mxu0 %v438_v51 }
 0x1fa   :  { %1033 = vmatpush3.msra.mxu0 %v438_v51 }
 0x1fb   :  { %1034 = vmatprep.subr.mxu0 %v437_v53 }
 0x1fc   :  { %1035 = vmatpush3.msra.mxu0 %v437_v53 }
 0x1fd   :  { %1036 = vmatprep.subr.mxu0 %v436_v55 }
 0x1fe   :  { %1037 = vmatpush3.msra.mxu0 %v436_v55 }
 0x1ff   :  { %1038 = vmatprep.subr.mxu0 %v435_v57 }
 0x200   :  { %1039 = vmatpush3.msra.mxu0 %v435_v57 }
 0x201   :  { %1040 = vmatprep.subr.mxu0 %v434_v59 }
 0x202   :  { %1041 = vmatpush3.msra.mxu0 %v434_v59 }
 0x203   :  { %1042 = vmatprep.subr.mxu0 %v433_v61 }
 0x204   :  { %1043 = vmatpush3.msra.mxu0 %v433_v61 }
 0x205   :  { %1044 = vmatprep.subr.mxu0 %v432_v63 }
 0x206   :  { %1045 = vmatpush3.msra.mxu0 %v432_v63 }
 0x207   :  { %1046 = vmatprep.subr.mxu0 %v431_v1 }
 0x208   :  { %1047 = vmatpush3.msra.mxu0 %v431_v1 }
 0x209   :  { %1048 = vmatprep.subr.mxu0 %v430_v3 }
 0x20a   :  { %1049 = vmatpush3.msra.mxu0 %v430_v3 }
 0x20b   :  { %1050 = vmatprep.subr.mxu0 %v429_v5 }
 0x20c   :  { %1051 = vmatpush3.msra.mxu0 %v429_v5 }
 0x20d   :  { %1052 = vmatprep.subr.mxu0 %v428_v7 }
 0x20e   :  { %1053 = vmatpush3.msra.mxu0 %v428_v7 }
 0x20f   :  { %1054 = vmatprep.subr.mxu0 %v427_v9 }
 0x210   :  { %1055 = vmatpush3.msra.mxu0 %v427_v9 }
 0x211   :  { %1056 = vmatprep.subr.mxu0 %v426_v11 }
 0x212   :  { %1057 = vmatpush3.msra.mxu0 %v426_v11 }
 0x213   :  { %1058 = vmatprep.subr.mxu0 %v425_v12 }
 0x214   :  { %1059 = vmatpush3.msra.mxu0 %v425_v12 }
 0x215   :  { %1060 = vmatprep.subr.mxu0 %v424_v13 }
 0x216   :  { %1061 = vmatpush3.msra.mxu0 %v424_v13 }
 0x217   :  { %1063 = vmatmul.mubr.f32.vlgmr.msra.gmra.mxu0 %v1326_v28  ;;  %v586_v28 = vld [vmem:[#allocation8 + $0x8] sm:$0xff] }
 0x218   :  { %1065 = vmatprep.mubr.f32.mxu0 %v1328_v30  ;;  %1114 = vmatprep.subr.mxu1 %v586_v28  ;;  %v585_v30 = vld [vmem:[#allocation8] sm:$0xff] }
 0x219   :  { %1115 = vmatpush3.msra.mxu1 %v586_v28 }
 0x21a   :  { %1116 = vmatprep.subr.mxu1 %v585_v30 }
 0x21b   :  { %1066 = vmatmul.mubr.f32.gmra.mxu0 %v1332_v32  ;;  %1117 = vmatpush3.msra.mxu1 %v585_v30 }
 0x21c   :  { %1068 = vmatprep.mubr.f32.mxu0 %v1334_v34 }
 0x21f   :  { %1069 = vmatmul.mubr.f32.gmra.mxu0 %v1338_v35 }
 0x220   :  { %1071 = vmatprep.mubr.f32.mxu0 %v1340_v36 }
 0x223   :  { %1072 = vmatmul.mubr.f32.gmra.mxu0 %v1344_v37 }
 0x224   :  { %1074 = vmatprep.mubr.f32.mxu0 %v1346_v38 }
 0x227   :  { %1075 = vmatmul.mubr.f32.gmra.mxu0 %v1350_v39 }
 0x228   :  { %1077 = vmatprep.mubr.f32.mxu0 %v1352_v40 }
 0x22b   :  { %1078 = vmatmul.mubr.f32.gmra.mxu0 %v1356_v41 }
 0x22c   :  { %1080 = vmatprep.mubr.f32.mxu0 %v1358_v42 }
 0x22f   :  { %1081 = vmatmul.mubr.f32.gmra.mxu0 %v1362_v43 }
 0x230   :  { %1083 = vmatprep.mubr.f32.mxu0 %v1364_v44 }
 0x233   :  { %1084 = vmatmul.mubr.f32.gmra.mxu0 %v1368_v45 }
 0x2d7   :  { %v1064_v32 = vpop.f32.mrf.mxu0 }
 0x2d9   :  { %v506_v34 = vpop.f32.mrf.mxu0 }
 0x2da   :  { %1118 = vmatprep.mubr.f32.mxu1 %v506_v34 }
 0x2db   :  { %v1067_v35 = vpop.f32.mrf.mxu0  ;;  %1119 = vmatmul.mubr.f32.vlgmr.msra.gmra.mxu1 %v1064_v32 }
 0x2dd   :  { %v516_v36 = vpop.f32.mrf.mxu0 }
 0x2de   :  { %1121 = vmatprep.mubr.f32.mxu1 %v516_v36 }
 0x2df   :  { %v1070_v37 = vpop.f32.mrf.mxu0  ;;  %1122 = vmatmul.mubr.f32.gmra.mxu1 %v1067_v35 }
 0x2e1   :  { %v526_v38 = vpop.f32.mrf.mxu0 }
 0x2e2   :  { %1124 = vmatprep.mubr.f32.mxu1 %v526_v38 }
 0x2e3   :  { %v1073_v39 = vpop.f32.mrf.mxu0  ;;  %1125 = vmatmul.mubr.f32.gmra.mxu1 %v1070_v37 }
 0x2e5   :  { %v536_v40 = vpop.f32.mrf.mxu0 }
 0x2e6   :  { %1127 = vmatprep.mubr.f32.mxu1 %v536_v40 }
 0x2e7   :  { %v1076_v41 = vpop.f32.mrf.mxu0  ;;  %1128 = vmatmul.mubr.f32.gmra.mxu1 %v1073_v39 }
 0x2e9   :  { %v546_v42 = vpop.f32.mrf.mxu0 }
 0x2ea   :  { %1130 = vmatprep.mubr.f32.mxu1 %v546_v42 }
 0x2eb   :  { %v1079_v43 = vpop.f32.mrf.mxu0  ;;  %1131 = vmatmul.mubr.f32.gmra.mxu1 %v1076_v41 }
 0x2ed   :  { %v556_v44 = vpop.f32.mrf.mxu0 }
 0x2ee   :  { %1133 = vmatprep.mubr.f32.mxu1 %v556_v44 }
 0x2ef   :  { %v1082_v45 = vpop.f32.mrf.mxu0  ;;  %1134 = vmatmul.mubr.f32.gmra.mxu1 %v1079_v43 }
 0x2f1   :  { %v566_v14 = vpop.f32.mrf.mxu0 }
 0x2f2   :  { %1136 = vmatprep.mubr.f32.mxu1 %v566_v14 }
 0x2f3   :  { %v1085_v15 = vpop.f32.mrf.mxu0  ;;  %1137 = vmatmul.mubr.f32.gmra.mxu1 %v1082_v45 }
 0x2f5   :  { %v576_v16 = vpop.f32.mrf.mxu0 }
 0x2f6   :  { %1139 = vmatprep.mubr.f32.mxu1 %v576_v16 }
 0x2f7   :  { %1140 = vmatmul.mubr.f32.gmra.mxu1 %v1085_v15 }
 0x39b   :  { %v1120_v18 = vpop.f32.mrf.mxu1 }
 0x39c   :  { %v680_v19 = vadd.f32 %v1120_v18, %v789_v17 }
 0x39d   :  { %v674_v20 = vpop.f32.mrf.mxu1 }
 0x39e   :  { %754 = vst [vmem:[#allocation10 + $0x8] sm:$0xff] %v680_v19  ;;  %v675_v21 = vadd.f32 %v789_v17, %v674_v20 }
 0x39f   :  { %v1123_v22 = vpop.f32.mrf.mxu1 }
 0x3a0   :  { %753 = vst [vmem:[#allocation10] sm:$0xff] %v675_v21  ;;  %v690_v23 = vadd.f32 %v1123_v22, %v789_v17 }
 0x3a1   :  { %v684_v24 = vpop.f32.mrf.mxu1 }
 0x3a2   :  { %756 = vst [vmem:[#allocation10 + $0x18] sm:$0xff] %v690_v23  ;;  %v685_v25 = vadd.f32 %v789_v17, %v684_v24 }
 0x3a3   :  { %v1126_v26 = vpop.f32.mrf.mxu1 }
 0x3a4   :  { %755 = vst [vmem:[#allocation10 + $0x10] sm:$0xff] %v685_v25  ;;  %v700_v27 = vadd.f32 %v1126_v26, %v789_v17 }
 0x3a5   :  { %v694_v29 = vpop.f32.mrf.mxu1 }
 0x3a6   :  { %758 = vst [vmem:[#allocation10 + $0x28] sm:$0xff] %v700_v27  ;;  %v695_v31 = vadd.f32 %v789_v17, %v694_v29 }
 0x3a7   :  { %v1129_v33 = vpop.f32.mrf.mxu1 }
 0x3a8   :  { %757 = vst [vmem:[#allocation10 + $0x20] sm:$0xff] %v695_v31  ;;  %v710_v46 = vadd.f32 %v1129_v33, %v789_v17 }
 0x3a9   :  { %v704_v47 = vpop.f32.mrf.mxu1 }
 0x3aa   :  { %760 = vst [vmem:[#allocation10 + $0x38] sm:$0xff] %v710_v46  ;;  %v705_v48 = vadd.f32 %v789_v17, %v704_v47 }
 0x3ab   :  { %v1132_v49 = vpop.f32.mrf.mxu1 }
 0x3ac   :  { %759 = vst [vmem:[#allocation10 + $0x30] sm:$0xff] %v705_v48  ;;  %v720_v50 = vadd.f32 %v1132_v49, %v789_v17 }
 0x3ad   :  { %v714_v51 = vpop.f32.mrf.mxu1 }
 0x3ae   :  { %762 = vst [vmem:[#allocation10 + $0x48] sm:$0xff] %v720_v50  ;;  %v715_v52 = vadd.f32 %v789_v17, %v714_v51 }
 0x3af   :  { %v1135_v53 = vpop.f32.mrf.mxu1 }
 0x3b0   :  { %761 = vst [vmem:[#allocation10 + $0x40] sm:$0xff] %v715_v52  ;;  %v730_v54 = vadd.f32 %v1135_v53, %v789_v17 }
 0x3b1   :  { %v724_v55 = vpop.f32.mrf.mxu1 }
 0x3b2   :  { %764 = vst [vmem:[#allocation10 + $0x58] sm:$0xff] %v730_v54  ;;  %v725_v56 = vadd.f32 %v789_v17, %v724_v55 }
 0x3b3   :  { %v1138_v57 = vpop.f32.mrf.mxu1 }
 0x3b4   :  { %763 = vst [vmem:[#allocation10 + $0x50] sm:$0xff] %v725_v56  ;;  %v740_v58 = vadd.f32 %v1138_v57, %v789_v17 }
 0x3b5   :  { %v734_v59 = vpop.f32.mrf.mxu1 }
 0x3b6   :  { %766 = vst [vmem:[#allocation10 + $0x68] sm:$0xff] %v740_v58  ;;  %v735_v60 = vadd.f32 %v789_v17, %v734_v59 }
 0x3b7   :  { %v1141_v61 = vpop.f32.mrf.mxu1 }
 0x3b8   :  { %765 = vst [vmem:[#allocation10 + $0x60] sm:$0xff] %v735_v60  ;;  %v750_v62 = vadd.f32 %v1141_v61, %v789_v17 }
 0x3b9   :  { %v744_v63 = vpop.f32.mrf.mxu1 }
 0x3ba   :  { %768 = vst [vmem:[#allocation10 + $0x78] sm:$0xff] %v750_v62  ;;  %v745_v0 = vadd.f32 %v789_v17, %v744_v63 }
 0x3bc   :  { %767 = vst [vmem:[#allocation10 + $0x70] sm:$0xff] %v745_v0 }
 0x3bd   :  { %1240 = shalt.err (!%p1237_p10)
}
 0x3be   :  { %780 = dma.vmem_to_hbm [thread:$0]  %s775_s18, 2048, %s1411_s6, [#allocation4], %s1259_s26, %s1259_s26, %s1260_s27  }
 0x3bf   :  { %1255 = dma.done.wait [#allocation4], 2048  }
 0x3c0   :  { %1256 = vsyncadd [#allocation4], 4294965248 }
 0x3c1   :  { %784 = vsyncpa [#allocation3], 1 }
 0x3c2   :  { %785 = vsyncpa [#allocation6], 1 }
 0x3c3   :  { %786 = vsyncpa [#allocation9], 1 }
 0x3c4   :  { %787 = vsyncpa [#allocation4], 1 }

</bundles_post_ra>
